<compile_context>
chip_gen: v6e
topology: v6e:2x2x1
jax: 0.10.0
libtpu: 0.0.40
codegen_flags: <defaults>
</compile_context>

<pallas_src>
import functools

import jax
import jax.numpy as jnp
import numpy as np
from jax.experimental import pallas as pl
from jax.experimental.pallas import tpu as pltpu


def _dequant_kernel(x_ref, m_ref, o_ref, *, offset):
    # x_ref: (TB, N*B) bits          -- lane-dense (last dim a multiple of 128)
    # m_ref: (N*B, N) dequant matrix -- resident across all grid steps
    # o_ref: (TB, N)                 -- lane-dense output block
    bits = x_ref[...].astype(jnp.float32)
    num = jnp.dot(bits, m_ref[...], preferred_element_type=jnp.float32)
    o_ref[...] = (num + offset).astype(o_ref.dtype)


def _build_dequant_matrix(N, B):
    """Block-diagonal (N*B, N) matrix: M[n*B + i, n] = 2^(B-1-i) / 2^B."""
    step = float(2 ** B)
    w = (2.0 ** np.arange(B - 1, -1, -1)) / step               # (B,)
    M = np.zeros((N * B, N), dtype=np.float32)
    rows = np.arange(N)[:, None] * B + np.arange(B)[None, :]   # (N, B)
    M[rows.reshape(-1), np.repeat(np.arange(N), B)] = np.tile(w, N)
    return jnp.asarray(M)


def _pick_batch_tile(batch, cap=256):
    """Largest multiple-of-8 tile that divides batch (capped), else full batch."""
    if batch % 8 != 0 or batch <= cap:
        return batch                       # full-extent block is always legal
    tb = cap
    while batch % tb != 0:
        tb -= 8
    return tb


def dequantization(x_bits, B):
    """Forward pass of DequantizationLayer.

    x_bits: (batch, N*B) float bits in {0, 1}
    returns (batch, N) float32
    """
    batch, total_bits = x_bits.shape
    assert total_bits % B == 0, "number of bits must be divisible by B"
    N = total_bits // B
    step = 2 ** B

    M = _build_dequant_matrix(N, B)                            # (N*B, N) constant

    TB = _pick_batch_tile(batch)
    grid = (batch // TB,)

    kernel = functools.partial(_dequant_kernel, offset=0.5 / step)

    out = pl.pallas_call(
        kernel,
        out_shape=jax.ShapeDtypeStruct((batch, N), jnp.float32),
        grid_spec=pltpu.PrefetchScalarGridSpec(
            num_scalar_prefetch=0,
            grid=grid,
            in_specs=[
                pl.BlockSpec((TB, total_bits), lambda b: (b, 0)),
                pl.BlockSpec((total_bits, N), lambda b: (0, 0)),  # stays resident
            ],
            out_specs=pl.BlockSpec((TB, N), lambda b: (b, 0)),
        ),
        compiler_params=pltpu.CompilerParams(
            dimension_semantics=("parallel",)),
    )(x_bits, M)
    return out


def _reference(x_bits, B):
    batch, total_bits = x_bits.shape
    N = total_bits // B
    step = 2 ** B
    bits = x_bits.astype(jnp.float32).reshape(batch, N, B)
    weights = (2.0 ** jnp.arange(B - 1, -1, -1)).astype(jnp.float32)
    num = jnp.einsum("bnk,k->bn", bits, weights)
    return (num + 0.5) / step


# TODO(synk): custom backward (grad repeat_interleave) is training-only; this is
# the forward pass as required.

if __name__ == "__main__":
    # DequantizationLayer(B=4), e.g. 512 feedback bits -> 128 dequantized values.
    B = 4
    feedback_bits = 512
    batch = 16

    key = jax.random.PRNGKey(0)
    x = jax.random.bernoulli(key, 0.5, (batch, feedback_bits)).astype(jnp.float32)

    out = dequantization(x, B)
    out = jax.block_until_ready(out)

    ref = jax.block_until_ready(_reference(x, B))

    assert out.shape == (batch, feedback_bits // B), out.shape
    np.testing.assert_allclose(np.asarray(out), np.asarray(ref),
                               rtol=1e-6, atol=1e-6)
    print("KERNEL_OK")
</pallas_src>

<mosaic_0001>
module attributes {stable_mosaic.version = 11 : i64} {
  func.func @_dequant_kernel(%arg0: i32, %arg1: memref<16x512xf32, #tpu.memory_space<vmem>>, %arg2: memref<512x128xf32, #tpu.memory_space<vmem>>, %arg3: memref<16x128xf32, #tpu.memory_space<vmem>>) attributes {dimension_semantics = [#tpu.dimension_semantics<parallel>], iteration_bounds = array<i64: 1>, scalar_prefetch = 0 : i64, scratch_operands = 0 : i64, tpu.core_type = #tpu.core_type<tc>, window_params = [{transform_indices = @transform_0, window_bounds = array<i64: 16, 512>}, {pipeline_mode = #tpu.pipeline_mode<synchronous>, transform_indices = @transform_1, window_bounds = array<i64: 512, 128>}, {transform_indices = @transform_2, window_bounds = array<i64: 16, 128>}]} {
    %c0 = arith.constant 0 : index
    %c0_0 = arith.constant 0 : index
    %0 = vector.load %arg1[%c0, %c0_0] : memref<16x512xf32, #tpu.memory_space<vmem>>, vector<16x512xf32>
    %c0_1 = arith.constant 0 : index
    %c0_2 = arith.constant 0 : index
    %1 = vector.load %arg2[%c0_1, %c0_2] : memref<512x128xf32, #tpu.memory_space<vmem>>, vector<512x128xf32>
    %cst = arith.constant dense<0.000000e+00> : vector<16x128xf32>
    %2 = tpu.matmul %0, %1, %cst {dimension_numbers = #tpu.dot_dimension_numbers<[1], [0], [0], [1], [0, 0, 1, 1], [], []>} : vector<16x512xf32>, vector<512x128xf32>, vector<16x128xf32> -> vector<16x128xf32>
    %cst_3 = arith.constant 3.125000e-02 : f32
    %3 = vector.broadcast %cst_3 : f32 to vector<16x128xf32>
    %4 = arith.addf %2, %3 : vector<16x128xf32>
    %c0_4 = arith.constant 0 : index
    %c0_5 = arith.constant 0 : index
    %5 = vector.load %arg3[%c0_4, %c0_5] : memref<16x128xf32, #tpu.memory_space<vmem>>, vector<16x128xf32>
    tpu.vector_store %arg3[%c0_4, %c0_5], %4 {strides = array<i32>} : memref<16x128xf32, #tpu.memory_space<vmem>>, vector<16x128xf32>,
    return
  }
  func.func @transform_0(%arg0: i32) -> (i32, i32) {
    %c0_i32 = arith.constant 0 : i32
    %c0_i32_0 = arith.constant 0 : i32
    return %arg0, %c0_i32 : i32, i32
  }
  func.func @transform_1(%arg0: i32) -> (i32, i32) {
    %c0_i32 = arith.constant 0 : i32
    %c0_i32_0 = arith.constant 0 : i32
    %c0_i32_1 = arith.constant 0 : i32
    return %c0_i32, %c0_i32_0 : i32, i32
  }
  func.func @transform_2(%arg0: i32) -> (i32, i32) {
    %c0_i32 = arith.constant 0 : i32
    %c0_i32_0 = arith.constant 0 : i32
    return %arg0, %c0_i32 : i32, i32
  }
}

</mosaic_0001>

<bundles_post_ra>
// kernel: tpu_custom_call.1
= control target key start
LH: loop header
LB: loop body
LE: loop exit
PB: predicated region body
PF: predicated region fallthrough
CT: control target
= control target key end

     0   :  { %7 = vsyncpa [#allocation3], 0  ;;  %s468_s0 = inlined_call_operand.hbm [shape: f32[16,512], index: 0, kind: input, shape index: {}]   ;;  %s469_s1 = inlined_call_operand.hbm [shape: f32[512,128], index: 1, kind: input, shape index: {}]   ;;  %s470_s2 = inlined_call_operand.hbm [shape: f32[16,128], index: 2, kind: output, shape index: {}]  }
   0x1   :  { %8 = vsyncpa [#allocation6], 0 }
   0x2   :  { %9 = vsyncpa [#allocation4], 0  ;;  %s431_s9 = smov [#allocation2]  }
   0x3   :  { %s15_s10 = sshll.u32 %s431_s9, 4  ;;  %s16_s10 = int_to_ptr.vmem [resolvable:$true] %s15_s10 }
   0x4   :  { %s373_s11 = scalar_lea.vmem %s16_s10, 1024  ;;  %p378_p1 = scmp.lt.s32.totalorder %s16_s10, %s16_s10 }
   0x5   :  { %p374_p0 = scmp.ne.s32.totalorder %s16_s10, %s373_s11  ;;  %p379_p2 = scmp.lt.s32.totalorder %s373_s11, %s373_s11 }
   0x7   :  { %p380_p3 = por %p379_p2, %p378_p1 }
   0x9   :  { %p381_p4 = pnand %p380_p3, %p374_p0 }
   0xb   :  { %384 = shalt.err (!%p381_p4)
}
   0xc   :  { %s432_s12 = smov 512   ;;  %s433_s13 = smov 32  }
   0xd   :  { %21 = dma.hbm_to_vmem [thread:$0]  %s468_s0, 1024, %s16_s10, [#allocation3], %s432_s12, %s432_s12, %s433_s13  }
   0xe   :  { %s434_s16 = smov [#allocation5]  }
   0xf   :  { %s27_s17 = sshll.u32 %s434_s16, 4  ;;  %s28_s17 = int_to_ptr.vmem [resolvable:$true] %s27_s17 }
  0x10   :  { %s393_s18 = scalar_lea.vmem %s28_s17, 8192  ;;  %p398_p6 = scmp.lt.s32.totalorder %s28_s17, %s28_s17 }
  0x11   :  { %p394_p5 = scmp.ne.s32.totalorder %s28_s17, %s393_s18  ;;  %p399_p7 = scmp.lt.s32.totalorder %s393_s18, %s393_s18 }
  0x13   :  { %p400_p8 = por %p399_p7, %p398_p6 }
  0x15   :  { %p401_p9 = pnand %p400_p8, %p394_p5 }
  0x17   :  { %404 = shalt.err (!%p401_p9)
}
  0x18   :  { %s435_s19 = smov 128   ;;  %s436_s20 = smov 8  }
  0x19   :  { %33 = dma.hbm_to_vmem [thread:$0]  %s469_s1, 8192, %s28_s17, [#allocation6], %s435_s19, %s435_s19, %s436_s20  }
  0x1a   :  { %425 = dma.done.wait [#allocation3], 1024  }
  0x1b   :  { %426 = vsyncadd [#allocation3], 4294966272 }
  0x1c   :  { %427 = dma.done.wait [#allocation6], 8192  }
  0x1d   :  { %428 = vsyncadd [#allocation6], 4294959104  ;;  %v79_v0 = vld [vmem:[#allocation5 + $0xf8] sm:$0xff]  ;;  %v78_v4 = vld [vmem:[#allocation5 + $0xf0] sm:$0xff]  ;;  %s437_s0 = smov [#allocation7]  }
  0x1e   :  { %v111_v1 = vld [vmem:[#allocation5 + $0x1f8] sm:$0xff]  ;;  %282 = vmatprep.subr.mxu0 %v79_v0  ;;  %v110_v5 = vld [vmem:[#allocation5 + $0x1f0] sm:$0xff]  ;;  %v77_v8 = vld [vmem:[#allocation5 + $0xe8] sm:$0xff]  ;;  %s269_s1 = sshll.u32 %s437_s0, 4  ;;  %s270_s1 = int_to_ptr.vmem [resolvable:$true] %s269_s1 }
  0x1f   :  { %v63_v2 = vld [vmem:[#allocation5 + $0x78] sm:$0xff]  ;;  %320 = vmatprep.subr.mxu1 %v111_v1  ;;  %v62_v6 = vld [vmem:[#allocation5 + $0x70] sm:$0xff]  ;;  %v109_v9 = vld [vmem:[#allocation5 + $0x1e8] sm:$0xff]  ;;  %s405_s23 = scalar_lea.vmem %s270_s1, 256  ;;  %p410_p11 = scmp.lt.s32.totalorder %s270_s1, %s270_s1 }
  0x20   :  { %v95_v3 = vld [vmem:[#allocation5 + $0x178] sm:$0xff]  ;;  %283 = vmatpush3.msra.mxu0 %v63_v2  ;;  %v94_v7 = vld [vmem:[#allocation5 + $0x170] sm:$0xff]  ;;  %v61_v10 = vld [vmem:[#allocation5 + $0x68] sm:$0xff]  ;;  %p406_p10 = scmp.ne.s32.totalorder %s270_s1, %s405_s23  ;;  %p411_p12 = scmp.lt.s32.totalorder %s405_s23, %s405_s23 }
  0x21   :  { %321 = vmatpush3.msra.mxu1 %v95_v3  ;;  %284 = vmatprep.subr.mxu0 %v78_v4  ;;  %v93_v11 = vld [vmem:[#allocation5 + $0x168] sm:$0xff]  ;;  %v76_v12 = vld [vmem:[#allocation5 + $0xe0] sm:$0xff]  ;;  %v75_v16 = vld [vmem:[#allocation5 + $0xd8] sm:$0xff] }
  0x22   :  { %322 = vmatprep.subr.mxu1 %v110_v5  ;;  %285 = vmatpush3.msra.mxu0 %v62_v6  ;;  %v108_v13 = vld [vmem:[#allocation5 + $0x1e0] sm:$0xff]  ;;  %v107_v17 = vld [vmem:[#allocation5 + $0x1d8] sm:$0xff]  ;;  %v74_v20 = vld [vmem:[#allocation5 + $0xd0] sm:$0xff]  ;;  %p412_p13 = por %p411_p12, %p410_p11 }
  0x23   :  { %323 = vmatpush3.msra.mxu1 %v94_v7  ;;  %286 = vmatprep.subr.mxu0 %v77_v8  ;;  %v60_v14 = vld [vmem:[#allocation5 + $0x60] sm:$0xff]  ;;  %v59_v18 = vld [vmem:[#allocation5 + $0x58] sm:$0xff]  ;;  %v106_v21 = vld [vmem:[#allocation5 + $0x1d0] sm:$0xff] }
  0x24   :  { %324 = vmatprep.subr.mxu1 %v109_v9  ;;  %v92_v15 = vld [vmem:[#allocation5 + $0x160] sm:$0xff]  ;;  %287 = vmatpush3.msra.mxu0 %v61_v10  ;;  %v91_v19 = vld [vmem:[#allocation5 + $0x158] sm:$0xff]  ;;  %v58_v22 = vld [vmem:[#allocation5 + $0x50] sm:$0xff]  ;;  %p413_p0 = pnand %p412_p13, %p406_p10 }
  0x25   :  { %325 = vmatpush3.msra.mxu1 %v93_v11  ;;  %288 = vmatprep.subr.mxu0 %v76_v12  ;;  %v90_v23 = vld [vmem:[#allocation5 + $0x150] sm:$0xff]  ;;  %v73_v24 = vld [vmem:[#allocation5 + $0xc8] sm:$0xff]  ;;  %v72_v28 = vld [vmem:[#allocation5 + $0xc0] sm:$0xff] }
  0x26   :  { %326 = vmatprep.subr.mxu1 %v108_v13  ;;  %289 = vmatpush3.msra.mxu0 %v60_v14  ;;  %v105_v25 = vld [vmem:[#allocation5 + $0x1c8] sm:$0xff]  ;;  %v104_v29 = vld [vmem:[#allocation5 + $0x1c0] sm:$0xff]  ;;  %v71_v32 = vld [vmem:[#allocation5 + $0xb8] sm:$0xff] }
  0x27   :  { %327 = vmatpush3.msra.mxu1 %v92_v15  ;;  %290 = vmatprep.subr.mxu0 %v75_v16  ;;  %v57_v26 = vld [vmem:[#allocation5 + $0x48] sm:$0xff]  ;;  %v56_v30 = vld [vmem:[#allocation5 + $0x40] sm:$0xff]  ;;  %v103_v33 = vld [vmem:[#allocation5 + $0x1b8] sm:$0xff] }
  0x28   :  { %328 = vmatprep.subr.mxu1 %v107_v17  ;;  %291 = vmatpush3.msra.mxu0 %v59_v18  ;;  %v89_v27 = vld [vmem:[#allocation5 + $0x148] sm:$0xff]  ;;  %v88_v31 = vld [vmem:[#allocation5 + $0x140] sm:$0xff]  ;;  %v55_v34 = vld [vmem:[#allocation5 + $0x38] sm:$0xff] }
  0x29   :  { %329 = vmatpush3.msra.mxu1 %v91_v19  ;;  %292 = vmatprep.subr.mxu0 %v74_v20  ;;  %v87_v35 = vld [vmem:[#allocation5 + $0x138] sm:$0xff]  ;;  %v70_v36 = vld [vmem:[#allocation5 + $0xb0] sm:$0xff]  ;;  %v69_v40 = vld [vmem:[#allocation5 + $0xa8] sm:$0xff] }
  0x2a   :  { %330 = vmatprep.subr.mxu1 %v106_v21  ;;  %293 = vmatpush3.msra.mxu0 %v58_v22  ;;  %v102_v37 = vld [vmem:[#allocation5 + $0x1b0] sm:$0xff]  ;;  %v101_v41 = vld [vmem:[#allocation5 + $0x1a8] sm:$0xff]  ;;  %v68_v44 = vld [vmem:[#allocation5 + $0xa0] sm:$0xff] }
  0x2b   :  { %331 = vmatpush3.msra.mxu1 %v90_v23  ;;  %294 = vmatprep.subr.mxu0 %v73_v24  ;;  %v54_v38 = vld [vmem:[#allocation5 + $0x30] sm:$0xff]  ;;  %v53_v42 = vld [vmem:[#allocation5 + $0x28] sm:$0xff]  ;;  %v100_v45 = vld [vmem:[#allocation5 + $0x1a0] sm:$0xff] }
  0x2c   :  { %332 = vmatprep.subr.mxu1 %v105_v25  ;;  %295 = vmatpush3.msra.mxu0 %v57_v26  ;;  %v86_v39 = vld [vmem:[#allocation5 + $0x130] sm:$0xff]  ;;  %v85_v43 = vld [vmem:[#allocation5 + $0x128] sm:$0xff]  ;;  %v52_v46 = vld [vmem:[#allocation5 + $0x20] sm:$0xff] }
  0x2d   :  { %333 = vmatpush3.msra.mxu1 %v89_v27  ;;  %296 = vmatprep.subr.mxu0 %v72_v28  ;;  %v84_v47 = vld [vmem:[#allocation5 + $0x120] sm:$0xff]  ;;  %v67_v48 = vld [vmem:[#allocation5 + $0x98] sm:$0xff]  ;;  %v66_v52 = vld [vmem:[#allocation5 + $0x90] sm:$0xff] }
  0x2e   :  { %334 = vmatprep.subr.mxu1 %v104_v29  ;;  %297 = vmatpush3.msra.mxu0 %v56_v30  ;;  %v99_v49 = vld [vmem:[#allocation5 + $0x198] sm:$0xff]  ;;  %v98_v53 = vld [vmem:[#allocation5 + $0x190] sm:$0xff]  ;;  %v65_v56 = vld [vmem:[#allocation5 + $0x88] sm:$0xff] }
  0x2f   :  { %335 = vmatpush3.msra.mxu1 %v88_v31  ;;  %298 = vmatprep.subr.mxu0 %v71_v32  ;;  %v51_v50 = vld [vmem:[#allocation5 + $0x18] sm:$0xff]  ;;  %v50_v54 = vld [vmem:[#allocation5 + $0x10] sm:$0xff]  ;;  %v97_v57 = vld [vmem:[#allocation5 + $0x188] sm:$0xff] }
  0x30   :  { %336 = vmatprep.subr.mxu1 %v103_v33  ;;  %299 = vmatpush3.msra.mxu0 %v55_v34  ;;  %v83_v51 = vld [vmem:[#allocation5 + $0x118] sm:$0xff]  ;;  %v82_v55 = vld [vmem:[#allocation5 + $0x110] sm:$0xff]  ;;  %v49_v58 = vld [vmem:[#allocation5 + $0x8] sm:$0xff] }
  0x31   :  { %337 = vmatpush3.msra.mxu1 %v87_v35  ;;  %300 = vmatprep.subr.mxu0 %v70_v36  ;;  %v81_v59 = vld [vmem:[#allocation5 + $0x108] sm:$0xff]  ;;  %v64_v60 = vld [vmem:[#allocation5 + $0x80] sm:$0xff]  ;;  %v43_v1 = vld [vmem:[#allocation2 + $0x18] sm:$0xff] }
  0x32   :  { %338 = vmatprep.subr.mxu1 %v102_v37  ;;  %301 = vmatpush3.msra.mxu0 %v54_v38  ;;  %v96_v61 = vld [vmem:[#allocation5 + $0x180] sm:$0xff]  ;;  %v41_v63 = vld [vmem:[#allocation2 + $0x8] sm:$0xff]  ;;  %v42_v3 = vld [vmem:[#allocation2 + $0x10] sm:$0xff] }
  0x33   :  { %339 = vmatpush3.msra.mxu1 %v86_v39  ;;  %302 = vmatprep.subr.mxu0 %v69_v40  ;;  %v48_v62 = vld [vmem:[#allocation5] sm:$0xff]  ;;  %v45_v4 = vld [vmem:[#allocation2 + $0x28] sm:$0xff]  ;;  %v47_v5 = vld [vmem:[#allocation2 + $0x38] sm:$0xff] }
  0x34   :  { %340 = vmatprep.subr.mxu1 %v101_v41  ;;  %303 = vmatpush3.msra.mxu0 %v53_v42  ;;  %v80_v0 = vld [vmem:[#allocation5 + $0x100] sm:$0xff]  ;;  %v46_v7 = vld [vmem:[#allocation2 + $0x30] sm:$0xff] }
  0x35   :  { %341 = vmatpush3.msra.mxu1 %v85_v43  ;;  %304 = vmatprep.subr.mxu0 %v68_v44  ;;  %v40_v2 = vld [vmem:[#allocation2] sm:$0xff] }
  0x36   :  { %342 = vmatprep.subr.mxu1 %v100_v45  ;;  %305 = vmatpush3.msra.mxu0 %v52_v46  ;;  %v44_v6 = vld [vmem:[#allocation2 + $0x20] sm:$0xff] }
  0x37   :  { %343 = vmatpush3.msra.mxu1 %v84_v47  ;;  %306 = vmatprep.subr.mxu0 %v67_v48 }
  0x38   :  { %344 = vmatprep.subr.mxu1 %v99_v49  ;;  %307 = vmatpush3.msra.mxu0 %v51_v50 }
  0x39   :  { %345 = vmatpush3.msra.mxu1 %v83_v51  ;;  %308 = vmatprep.subr.mxu0 %v66_v52 }
  0x3a   :  { %346 = vmatprep.subr.mxu1 %v98_v53  ;;  %309 = vmatpush3.msra.mxu0 %v50_v54 }
  0x3b   :  { %347 = vmatpush3.msra.mxu1 %v82_v55  ;;  %310 = vmatprep.subr.mxu0 %v65_v56 }
  0x3c   :  { %348 = vmatprep.subr.mxu1 %v97_v57  ;;  %311 = vmatpush3.msra.mxu0 %v49_v58 }
  0x3d   :  { %349 = vmatpush3.msra.mxu1 %v81_v59  ;;  %312 = vmatprep.subr.mxu0 %v64_v60 }
  0x3e   :  { %350 = vmatprep.subr.mxu1 %v96_v61  ;;  %313 = vmatpush3.msra.mxu0 %v48_v62 }
  0x3f   :  { %176 = vmatprep.mubr.f32.mxu0 %v41_v63  ;;  %351 = vmatpush3.msra.mxu1 %v80_v0 }
  0x40   :  { %251 = vmatprep.mubr.f32.mxu1 %v43_v1  ;;  %177 = vmatmul.mubr.f32.vlgmr.msra.gmra.mxu0 %v40_v2 }
  0x41   :  { %252 = vmatmul.mubr.f32.vlgmr.msra.gmra.mxu1 %v42_v3  ;;  %181 = vmatprep.mubr.f32.mxu0 %v45_v4 }
  0x42   :  { %256 = vmatprep.mubr.f32.mxu1 %v47_v5 }
  0x44   :  { %182 = vmatmul.mubr.f32.gmra.mxu0 %v44_v6 }
  0x45   :  { %257 = vmatmul.mubr.f32.gmra.mxu1 %v46_v7 }
 0x100   :  { %v314_v8 = vpop.f32.mrf.mxu0 }
 0x101   :  { %v352_v9 = vpop.f32.mrf.mxu1 }
 0x102   :  { %v315_v10 = vpop.f32.mrf.mxu0 }
 0x103   :  { %v353_v11 = vpop.f32.mrf.mxu1  ;;  %v316_v12 = vadd.f32 %v315_v10, %v314_v8 }
 0x104   :  { %v317_v13 = vpop.f32.mrf.mxu0  ;;  %v354_v16 = vadd.f32 %v353_v11, %v352_v9 }
 0x105   :  { %v355_v14 = vpop.f32.mrf.mxu1  ;;  %v179_v15 = vadd.f32 0.03125, %v316_v12 }
 0x106   :  { %v318_v17 = vpop.f32.mrf.mxu0 }
 0x107   :  { %v356_v18 = vpop.f32.mrf.mxu1  ;;  %v254_v19 = vadd.f32 %v354_v16, %v179_v15  ;;  %v319_v20 = vadd.f32 %v318_v17, %v317_v13 }
 0x108   :  { %v357_v22 = vadd.f32 %v356_v18, %v355_v14 }
 0x109   :  { %262 = vst [vmem:[#allocation7] sm:$0xff] %v254_v19  ;;  %v184_v21 = vadd.f32 0.03125, %v319_v20 }
 0x10b   :  { %v259_v23 = vadd.f32 %v357_v22, %v184_v21 }
 0x10d   :  { %263 = vst [vmem:[#allocation7 + $0x8] sm:$0xff] %v259_v23 }
 0x10e   :  { %416 = shalt.err (!%p413_p0)
}
 0x10f   :  { %275 = dma.vmem_to_hbm [thread:$0]  %s270_s1, 256, %s470_s2, [#allocation4], %s435_s19, %s435_s19, %s436_s20  }
 0x110   :  { %429 = dma.done.wait [#allocation4], 256  }
 0x111   :  { %430 = vsyncadd [#allocation4], 4294967040 }
 0x112   :  { %279 = vsyncpa [#allocation3], 1 }
 0x113   :  { %280 = vsyncpa [#allocation6], 1 }
 0x114   :  { %281 = vsyncpa [#allocation4], 1 }

</bundles_post_ra>
